<compile_context>
chip_gen: v7x
topology: tpu7x:2x2x1
jax: 0.10.0
libtpu: 0.0.40
codegen_flags: <defaults>
</compile_context>

<pallas_src>
import jax
import jax.numpy as jnp
from jax.experimental import pallas as pl
from jax.experimental.pallas import tpu as pltpu


def mlp_kernel(x_ref, w1_ref, b1_ref, w2_ref, b2_ref, w3_ref, b3_ref, o_ref):
    # x tile arrives batch-major (TILE_B, 15) straight from HBM.  The .T is
    # the only relayout: after it, batch lives on the 128-wide lane axis so
    # every intermediate and the output are lane-dense.
    # Linear(15, 30) + ReLU   ->  (30, 15) @ (15, TB) = (30, TB)
    h1 = jnp.dot(w1_ref[...], x_ref[...].T, preferred_element_type=jnp.float32)
    h1 = jnp.maximum(h1 + b1_ref[...], 0.0)

    # Linear(30, 15) + ReLU   ->  (15, 30) @ (30, TB) = (15, TB)
    h2 = jnp.dot(w2_ref[...], h1, preferred_element_type=jnp.float32)
    h2 = jnp.maximum(h2 + b2_ref[...], 0.0)

    # Linear(15, 1) + Sigmoid ->  (1, 15) @ (15, TB) = (1, TB)
    h3 = jnp.dot(w3_ref[...], h2, preferred_element_type=jnp.float32)
    h3 = h3 + b3_ref[...]
    # exp sits in the EUP slot; kernel is HBM/overhead bound so this is free.
    o_ref[...] = (1.0 / (1.0 + jnp.exp(-h3))).astype(o_ref.dtype)


def _round_up(n, m):
    return ((n + m - 1) // m) * m


def net_forward(x, params, *, max_tile_b=8192):
    """x: (B, 15) float32 -> (B, 1) float32 (same semantics as the torch Net)."""
    w1, b1, w2, b2, w3, b3 = params  # torch layout: W (out, in), b (out, 1)
    B, F = x.shape

    # Lane-aligned batch tile: as large as possible (amortize per-grid-step
    # cost, long DMAs) but aimed at >= 2 tiles so v7x megacore can split the
    # parallel batch axis across both TensorCores.  (tb, 15) f32 staging is
    # lane-padded to (tb, 128) in VMEM: tb=8192 -> ~4 MiB/buffer, 8 MiB
    # double-buffered, comfortably under every generation's VMEM budget.
    tb = max(128, min(max_tile_b, _round_up(pl.cdiv(B, 2), 128)))
    num_tiles = pl.cdiv(B, tb)  # ragged last block handled by Pallas masking

    def resident(a):  # full-array block, constant index -> stays in VMEM
        return pl.BlockSpec(a.shape, lambda i: (0, 0))

    out = pl.pallas_call(
        mlp_kernel,
        out_shape=jax.ShapeDtypeStruct((1, B), jnp.float32),
        grid=(num_tiles,),
        in_specs=[
            pl.BlockSpec((tb, F), lambda i: (i, 0)),      # native (B,15) input
            resident(w1), resident(b1),
            resident(w2), resident(b2),
            resident(w3), resident(b3),
        ],
        out_specs=pl.BlockSpec((1, tb), lambda i: (0, i)),  # lane-dense output
        compiler_params=pltpu.CompilerParams(
            dimension_semantics=("parallel",),   # shard batch tiles across TCs
            vmem_limit_bytes=32 * 1024 * 1024,
        ),
    )(x, w1, b1, w2, b2, w3, b3)

    # (1, B) -> (B, 1): pure reshape of a contiguous row, no transpose copy.
    return out.reshape(B, 1)


def init_params(key):
    """Deterministic init mimicking torch.nn.Linear default (U[-1/sqrt(fan_in), +])."""
    def linear(k, fan_in, fan_out):
        kw, kb = jax.random.split(k)
        bound = 1.0 / jnp.sqrt(float(fan_in))
        w = jax.random.uniform(kw, (fan_out, fan_in), jnp.float32, -bound, bound)
        b = jax.random.uniform(kb, (fan_out, 1), jnp.float32, -bound, bound)
        return w, b

    k1, k2, k3 = jax.random.split(key, 3)
    w1, b1 = linear(k1, 15, 30)
    w2, b2 = linear(k2, 30, 15)
    w3, b3 = linear(k3, 15, 1)
    return w1, b1, w2, b2, w3, b3


def reference(x, params):
    w1, b1, w2, b2, w3, b3 = params
    h = jnp.maximum(x @ w1.T + b1.T, 0.0)
    h = jnp.maximum(h @ w2.T + b2.T, 0.0)
    return jax.nn.sigmoid(h @ w3.T + b3.T)


if __name__ == "__main__":
    key = jax.random.PRNGKey(0)
    kx, kp = jax.random.split(key)
    params = init_params(kp)

    # B=8: single ragged tile; B=200: two tiles with ragged tail;
    # B=1024: two full lane-aligned tiles (exercises the megacore split).
    for B in (8, 200, 1024):
        x = jax.random.normal(jax.random.fold_in(kx, B), (B, 15), jnp.float32)
        out = jax.block_until_ready(net_forward(x, params))
        ref = reference(x, params)
        assert out.shape == (B, 1), f"bad output shape {out.shape} for B={B}"
        assert jnp.allclose(out, ref, atol=1e-5), f"mismatch vs reference at B={B}"

    print("KERNEL_OK")
</pallas_src>

<mosaic_0001>
module attributes {stable_mosaic.version = 11 : i64} {
  func.func @mlp_kernel(%arg0: i32, %arg1: memref<128x15xf32, #tpu.memory_space<vmem>>, %arg2: memref<30x15xf32, #tpu.memory_space<vmem>>, %arg3: memref<30x1xf32, #tpu.memory_space<vmem>>, %arg4: memref<15x30xf32, #tpu.memory_space<vmem>>, %arg5: memref<15x1xf32, #tpu.memory_space<vmem>>, %arg6: memref<1x15xf32, #tpu.memory_space<vmem>>, %arg7: memref<1x1xf32, #tpu.memory_space<vmem>>, %arg8: memref<1x128xf32, #tpu.memory_space<vmem>>) attributes {dimension_semantics = [#tpu.dimension_semantics<parallel>], iteration_bounds = array<i64: 1>, scalar_prefetch = 0 : i64, scratch_operands = 0 : i64, tpu.core_type = #tpu.core_type<tc>, window_params = [{transform_indices = @transform_0, window_bounds = array<i64: 128, 15>}, {pipeline_mode = #tpu.pipeline_mode<synchronous>, transform_indices = @transform_1, window_bounds = array<i64: 30, 15>}, {pipeline_mode = #tpu.pipeline_mode<synchronous>, transform_indices = @transform_2, window_bounds = array<i64: 30, 1>}, {pipeline_mode = #tpu.pipeline_mode<synchronous>, transform_indices = @transform_3, window_bounds = array<i64: 15, 30>}, {pipeline_mode = #tpu.pipeline_mode<synchronous>, transform_indices = @transform_4, window_bounds = array<i64: 15, 1>}, {pipeline_mode = #tpu.pipeline_mode<synchronous>, transform_indices = @transform_5, window_bounds = array<i64: 1, 15>}, {pipeline_mode = #tpu.pipeline_mode<synchronous>, transform_indices = @transform_6, window_bounds = array<i64: 1, 1>}, {transform_indices = @transform_7, window_bounds = array<i64: 1, 128>}]} {
    %c0 = arith.constant 0 : index
    %c0_0 = arith.constant 0 : index
    %0 = vector.load %arg2[%c0, %c0_0] : memref<30x15xf32, #tpu.memory_space<vmem>>, vector<30x15xf32>
    %c0_1 = arith.constant 0 : index
    %c0_2 = arith.constant 0 : index
    %1 = vector.load %arg1[%c0_1, %c0_2] : memref<128x15xf32, #tpu.memory_space<vmem>>, vector<128x15xf32>
    %2 = tpu.transpose %1, [1, 0] : vector<128x15xf32> -> vector<15x128xf32>
    %cst = arith.constant dense<0.000000e+00> : vector<30x128xf32>
    %3 = tpu.matmul %0, %2, %cst {dimension_numbers = #tpu.dot_dimension_numbers<[1], [0], [0], [1], [0, 0, 1, 1], [], []>} : vector<30x15xf32>, vector<15x128xf32>, vector<30x128xf32> -> vector<30x128xf32>
    %c0_3 = arith.constant 0 : index
    %c0_4 = arith.constant 0 : index
    %4 = vector.load %arg3[%c0_3, %c0_4] : memref<30x1xf32, #tpu.memory_space<vmem>>, vector<30x1xf32>
    %5 = vector.broadcast %4 : vector<30x1xf32> to vector<30x128xf32>
    %6 = arith.addf %3, %5 : vector<30x128xf32>
    %cst_5 = arith.constant 0.000000e+00 : f32
    %7 = vector.broadcast %cst_5 : f32 to vector<30x128xf32>
    %8 = arith.maximumf %6, %7 : vector<30x128xf32>
    %c0_6 = arith.constant 0 : index
    %c0_7 = arith.constant 0 : index
    %9 = vector.load %arg4[%c0_6, %c0_7] : memref<15x30xf32, #tpu.memory_space<vmem>>, vector<15x30xf32>
    %cst_8 = arith.constant dense<0.000000e+00> : vector<15x128xf32>
    %10 = tpu.matmul %9, %8, %cst_8 {dimension_numbers = #tpu.dot_dimension_numbers<[1], [0], [0], [1], [0, 0, 1, 1], [], []>} : vector<15x30xf32>, vector<30x128xf32>, vector<15x128xf32> -> vector<15x128xf32>
    %c0_9 = arith.constant 0 : index
    %c0_10 = arith.constant 0 : index
    %11 = vector.load %arg5[%c0_9, %c0_10] : memref<15x1xf32, #tpu.memory_space<vmem>>, vector<15x1xf32>
    %12 = vector.broadcast %11 : vector<15x1xf32> to vector<15x128xf32>
    %13 = arith.addf %10, %12 : vector<15x128xf32>
    %cst_11 = arith.constant 0.000000e+00 : f32
    %14 = vector.broadcast %cst_11 : f32 to vector<15x128xf32>
    %15 = arith.maximumf %13, %14 : vector<15x128xf32>
    %c0_12 = arith.constant 0 : index
    %c0_13 = arith.constant 0 : index
    %16 = vector.load %arg6[%c0_12, %c0_13] : memref<1x15xf32, #tpu.memory_space<vmem>>, vector<1x15xf32>
    %cst_14 = arith.constant dense<0.000000e+00> : vector<1x128xf32>
    %17 = tpu.matmul %16, %15, %cst_14 {dimension_numbers = #tpu.dot_dimension_numbers<[1], [0], [0], [1], [0, 0, 1, 1], [], []>} : vector<1x15xf32>, vector<15x128xf32>, vector<1x128xf32> -> vector<1x128xf32>
    %c0_15 = arith.constant 0 : index
    %c0_16 = arith.constant 0 : index
    %18 = vector.load %arg7[%c0_15, %c0_16] : memref<1x1xf32, #tpu.memory_space<vmem>>, vector<1x1xf32>
    %19 = vector.broadcast %18 : vector<1x1xf32> to vector<1x128xf32>
    %20 = arith.addf %17, %19 : vector<1x128xf32>
    %cst_17 = arith.constant 0.000000e+00 : f32
    %21 = vector.broadcast %cst_17 : f32 to vector<1x128xf32>
    %22 = arith.subf %21, %20 : vector<1x128xf32>
    %23 = math.exp %22 : vector<1x128xf32>
    %cst_18 = arith.constant 1.000000e+00 : f32
    %24 = vector.broadcast %cst_18 : f32 to vector<1x128xf32>
    %25 = arith.addf %24, %23 : vector<1x128xf32>
    %cst_19 = arith.constant 1.000000e+00 : f32
    %26 = vector.broadcast %cst_19 : f32 to vector<1x128xf32>
    %27 = arith.divf %26, %25 : vector<1x128xf32>
    %c0_20 = arith.constant 0 : index
    %c0_21 = arith.constant 0 : index
    %28 = vector.load %arg8[%c0_20, %c0_21] : memref<1x128xf32, #tpu.memory_space<vmem>>, vector<1x128xf32>
    tpu.vector_store %arg8[%c0_20, %c0_21], %27 {strides = array<i32>} : memref<1x128xf32, #tpu.memory_space<vmem>>, vector<1x128xf32>,
    return
  }
  func.func @transform_0(%arg0: i32) -> (i32, i32) {
    %c0_i32 = arith.constant 0 : i32
    %c0_i32_0 = arith.constant 0 : i32
    return %arg0, %c0_i32 : i32, i32
  }
  func.func @transform_1(%arg0: i32) -> (i32, i32) {
    %c0_i32 = arith.constant 0 : i32
    %c0_i32_0 = arith.constant 0 : i32
    %c0_i32_1 = arith.constant 0 : i32
    return %c0_i32, %c0_i32_0 : i32, i32
  }
  func.func @transform_2(%arg0: i32) -> (i32, i32) {
    %c0_i32 = arith.constant 0 : i32
    %c0_i32_0 = arith.constant 0 : i32
    %c0_i32_1 = arith.constant 0 : i32
    return %c0_i32, %c0_i32_0 : i32, i32
  }
  func.func @transform_3(%arg0: i32) -> (i32, i32) {
    %c0_i32 = arith.constant 0 : i32
    %c0_i32_0 = arith.constant 0 : i32
    %c0_i32_1 = arith.constant 0 : i32
    return %c0_i32, %c0_i32_0 : i32, i32
  }
  func.func @transform_4(%arg0: i32) -> (i32, i32) {
    %c0_i32 = arith.constant 0 : i32
    %c0_i32_0 = arith.constant 0 : i32
    %c0_i32_1 = arith.constant 0 : i32
    return %c0_i32, %c0_i32_0 : i32, i32
  }
  func.func @transform_5(%arg0: i32) -> (i32, i32) {
    %c0_i32 = arith.constant 0 : i32
    %c0_i32_0 = arith.constant 0 : i32
    %c0_i32_1 = arith.constant 0 : i32
    return %c0_i32, %c0_i32_0 : i32, i32
  }
  func.func @transform_6(%arg0: i32) -> (i32, i32) {
    %c0_i32 = arith.constant 0 : i32
    %c0_i32_0 = arith.constant 0 : i32
    %c0_i32_1 = arith.constant 0 : i32
    return %c0_i32, %c0_i32_0 : i32, i32
  }
  func.func @transform_7(%arg0: i32) -> (i32, i32) {
    %c0_i32 = arith.constant 0 : i32
    %c0_i32_0 = arith.constant 0 : i32
    return %c0_i32, %arg0 : i32, i32
  }
}

</mosaic_0001>

<bundles_post_ra>
// kernel: tpu_custom_call.1
= control target key start
LH: loop header
LB: loop body
LE: loop exit
PB: predicated region body
PF: predicated region fallthrough
CT: control target
= control target key end

     0   :  { %s837_s0 = inlined_call_operand.vmem [shape: f32[8,15], index: 0, kind: input, shape index: {}]   ;;  %s838_s1 = inlined_call_operand.vmem [shape: f32[30,15], index: 1, kind: input, shape index: {}]   ;;  %s839_s2 = inlined_call_operand.vmem [shape: f32[30,1], index: 2, kind: input, shape index: {}]   ;;  %s840_s3 = inlined_call_operand.vmem [shape: f32[15,30], index: 3, kind: input, shape index: {}]   ;;  %s841_s4 = inlined_call_operand.vmem [shape: f32[15,1], index: 4, kind: input, shape index: {}]   ;;  %s842_s5 = inlined_call_operand.vmem [shape: f32[1,15], index: 5, kind: input, shape index: {}]   ;;  %s843_s6 = inlined_call_operand.<no memory space> [shape: f32[1,1], index: 6, kind: input, shape index: {}]   ;;  %s844_s7 = inlined_call_operand.hbm [shape: f32[1,8], index: 7, kind: output, shape index: {}]  }
   0x1   :  { %v12_v0 = vstv %s843_s6 }
   0x2   :  { %13 = vst [vmem:[#allocation2] sm:$0x1] %v12_v0 }
   0x3   :  { %v33_v1 = vld [vmem:[%s837_s0] sm:$0xff]  ;;  %v34_v2 = vld [vmem:[%s837_s0 + $0x8] sm:$0xff]  ;;  %vm73_vm0 = vcmask 121856   ;;  %v35_v3 = vld [vmem:[%s837_s0 + $0x10] sm:$0xff]  ;;  %v642_v7 = vmov 0  }
   0x4   :  { %v544_v4 = vpack.c.bf16 %v34_v2, %v33_v1  ;;  %vm702_vm1 = vmpackc.low %vm73_vm0, %vm73_vm0  ;;  %v36_v6 = vld [vmem:[%s837_s0 + $0x18] sm:$0xff]  ;;  %612 = vset.pattern.permute.xlu0 %v642_v7  ;;  %613 = vset.pattern.permute.xlu1 %v642_v7  ;;  %v29_v9 = vld [vmem:[%s838_s1] sm:$0xff] }
   0x5   :  { %v550_v8 = vpack.c.bf16 %v36_v6, %v35_v3  ;;  %v37_v10 = vld [vmem:[%s837_s0 + $0x20] sm:$0xff]  ;;  %v38_v11 = vld [vmem:[%s837_s0 + $0x28] sm:$0xff]  ;;  %520 = vmatprep.mubr.msk.f32.mxu0 %vm73_vm0, %v29_v9  ;;  %v51_v13 = vld [vmem:[%s839_s2 + $0x10] sm:$0xff] }
   0x6   :  { %546 = vmatprep.subr.msk.bf16.mxu0 %vm702_vm1, %v544_v4  ;;  %v49_v12 = vld [vmem:[%s839_s2] sm:$0xff]  ;;  %65 = vperm.xlu1 %613, %v51_v13   ;;  %v556_v14 = vpack.c.bf16 %v38_v11, %v37_v10  ;;  %v50_v15 = vld [vmem:[%s839_s2 + $0x8] sm:$0xff] }
   0x7   :  { %549 = vmatpush3.bf16.xpose.msk.msra.mxu0 %vm702_vm1, %v544_v4  ;;  %55 = vperm.xlu0 %612, %v49_v12  }
   0x8   :  { %552 = vmatprep.subr.msk.bf16.mxu0 %vm702_vm1, %v550_v8 }
   0x9   :  { %14 = vsyncpa [#allocation4], 0  ;;  %v52_v16 = vld [vmem:[%s839_s2 + $0x18] sm:$0x3f]  ;;  %v225_v17 = vld [vmem:[%s841_s4] sm:$0xff]  ;;  %vm237_vm2 = vcmask 244736   ;;  %v332_v6 = vlaneseq }
   0xa   :  { %70 = vperm.xlu1 %613, %v52_v16   ;;  %v39_v18 = vld [vmem:[%s837_s0 + $0x30] sm:$0xff]  ;;  %v40_v19 = vld [vmem:[%s837_s0 + $0x38] sm:$0xff]  ;;  %v226_v20 = vld [vmem:[%s841_s4 + $0x8] sm:$0x7f]  ;;  %vm244_vm3 = vcmask 1045504   ;;  %vm643_vm4 = vmmov 1  }
   0xb   :  { %60 = vperm.xlu0 %612, %v50_v15   ;;  %v562_v21 = vpack.c.bf16 %v40_v19, %v39_v18  ;;  %v326_v22 = vld [vmem:[#allocation2] sm:$0x1]  ;;  %v42_v24 = vld [vmem:[%s837_s0 + $0x48] sm:$0xff]  ;;  %v43_v26 = vld [vmem:[%s837_s0 + $0x50] sm:$0xff]  ;;  %v644_v58 = vmov 0.0|0.0   ;;  %vm645_vm6 = vmmov 0  }
   0xc   :  { %v41_v23 = vld [vmem:[%s837_s0 + $0x40] sm:$0xff]  ;;  %v44_v27 = vld [vmem:[%s837_s0 + $0x58] sm:$0xff]  ;;  %v46_v30 = vld [vmem:[%s837_s0 + $0x68] sm:$0xff]  ;;  %v646_v59 = vmov 0.0   ;;  %vm339_vm7 = vcmask 1046528   ;;  %v333_v7 = vshrl.u32 %v332_v6, 7 }
   0xd   :  { %v568_v25 = vpack.c.bf16 %v42_v24, %v41_v23  ;;  %v574_v28 = vpack.c.bf16 %v44_v27, %v43_v26  ;;  %v45_v29 = vld [vmem:[%s837_s0 + $0x60] sm:$0xff]  ;;  %v47_v32 = vld [vmem:[%s837_s0 + $0x70] sm:$0xff]  ;;  %v48_v33 = vld [vmem:[%s837_s0 + $0x78] sm:$0xff]  ;;  %s647_s30 = smov [#allocation3]  }
   0xe   :  { %234 = vperm.xlu1 %613, %v226_v20   ;;  %v580_v31 = vpack.c.bf16 %v46_v30, %v45_v29  ;;  %v586_v34 = vpack.c.bf16 %v48_v33, %v47_v32  ;;  %v30_v35 = vld [vmem:[%s838_s1 + $0x8] sm:$0xff]  ;;  %v31_v36 = vld [vmem:[%s838_s1 + $0x10] sm:$0xff]  ;;  %v32_v37 = vld [vmem:[%s838_s1 + $0x18] sm:$0x3f]  ;;  %s426_s8 = sshll.u32 %s647_s30, 4  ;;  %s427_s8 = int_to_ptr.vmem [resolvable:$true] %s426_s8 }
   0xf   :  { %555 = vmatpush3.bf16.xpose.msk.msra.mxu0 %vm702_vm1, %v550_v8  ;;  %229 = vperm.xlu0 %612, %v225_v17   ;;  %v223_v38 = vld [vmem:[%s840_s3] sm:$0xff]  ;;  %vm597_vm5 = vmpackc.low %vm244_vm3, %vm643_vm4  ;;  %v224_v57 = vld [vmem:[%s840_s3 + $0x8] sm:$0x7f]  ;;  %v334_v8 = vsub.s32 0, %v333_v7  ;;  %s622_s6 = scalar_lea.vmem %s427_s8, 32  ;;  %p623_p1 = scmp.lt.s32.totalorder %s427_s8, %s427_s8 }
  0x10   :  { %558 = vmatprep.subr.msk.bf16.mxu0 %vm702_vm1, %v556_v14  ;;  %534 = vmatprep.mubr.msk.f32.mxu1 %vm237_vm2, %v223_v38  ;;  %vm604_vm8 = vmpackc.low %vm339_vm7, %vm643_vm4  ;;  %v325_v5 = vld [vmem:[%s842_s5] sm:$0x1]  ;;  %s618_s5 = scalar_lea.vmem %s427_s8, 16 }
  0x11   :  { %p619_p0 = scmp.ne.s32.totalorder %s427_s8, %s618_s5  ;;  %p624_p2 = scmp.lt.s32.totalorder %s622_s6, %s618_s5 }
  0x13   :  { %329 = vperm.xlu0 %612, %v326_v22   ;;  %p625_p3 = por %p624_p2, %p623_p1 }
  0x15   :  { %p626_p4 = pnand %p625_p3, %p619_p0 }
  0x17   :  { %561 = vmatpush3.bf16.xpose.msk.msra.mxu0 %vm702_vm1, %v556_v14 }
  0x18   :  { %564 = vmatprep.subr.msk.bf16.mxu0 %vm702_vm1, %v562_v21 }
  0x1f   :  { %567 = vmatpush3.bf16.xpose.msk.msra.mxu0 %vm702_vm1, %v562_v21 }
  0x20   :  { %570 = vmatprep.subr.msk.bf16.mxu0 %vm702_vm1, %v568_v25 }
  0x27   :  { %573 = vmatpush3.bf16.xpose.msk.msra.mxu0 %vm702_vm1, %v568_v25 }
  0x28   :  { %576 = vmatprep.subr.msk.bf16.mxu0 %vm702_vm1, %v574_v28 }
  0x2f   :  { %579 = vmatpush3.bf16.xpose.msk.msra.mxu0 %vm702_vm1, %v574_v28 }
  0x30   :  { %582 = vmatprep.subr.msk.bf16.mxu0 %vm702_vm1, %v580_v31 }
  0x37   :  { %585 = vmatpush3.bf16.xpose.msk.msra.mxu0 %vm702_vm1, %v580_v31 }
  0x38   :  { %588 = vmatprep.subr.msk.bf16.mxu0 %vm702_vm1, %v586_v34 }
  0x3f   :  { %591 = vmatpush3.bf16.xpose.msk.msra.mxu0 %vm702_vm1, %v586_v34 }
  0x46   :  { %521 = vmatmul.mubr.msk.f32.vlgmr.msra.gmra.mrb[0].mxu0 %vm73_vm0, %v30_v35 }
  0x47   :  { %523 = vmatprep.mubr.msk.f32.mxu0 %vm73_vm0, %v31_v36 }
  0x4a   :  { %524 = vmatmul.mubr.msk.f32.gmra.mrb[2].mxu0 %vm73_vm0, %v32_v37 }
  0x85   :  { %v66_v40 = vpop.permute.xlu1 %65 }
  0x86   :  { %v56_v39 = vpop.permute.xlu0 %55 }
  0x89   :  { %v71_v47 = vpop.permute.xlu1 %70 }
  0x8a   :  { %v61_v41 = vpop.permute.xlu0 %60 }
  0x8d   :  { %v235_v60 = vpop.permute.xlu1 %234 }
  0x8e   :  { %v230_v62 = vpop.permute.xlu0 %229 }
  0x92   :  { %v330_v9 = vpop.permute.xlu0 %329 }
  0x93   :  { %v335_v10 = vrot.slane %v330_v9, %v334_v8 }
 0x119   :  { %v522_v42 = vpop.f32.mrb[0].mxu0 }
 0x11a   :  { %v206_v43 = vadd.f32 %v522_v42, %v61_v41  ;;  %v200_v44 = vpop.f32.mrb[1].mxu0 }
 0x11b   :  { %v201_v45 = vadd.f32 %v200_v44, %v56_v39 }
 0x11c   :  { %v220_v46 = vmax.f32 %v206_v43, 0.0 }
 0x11d   :  { %v219_v48 = vmax.f32 %v201_v45, 0.0  ;;  %v525_v49 = vpop.f32.mrb[2].mxu0 }
 0x11e   :  { %v216_v50 = vadd.f32 %v525_v49, %v71_v47  ;;  %v210_v51 = vpop.f32.mrb[3].mxu0 }
 0x11f   :  { %v211_v52 = vadd.f32 %v210_v51, %v66_v40  ;;  %v592_v53 = vpack.c.bf16 %v220_v46, %v219_v48 }
 0x120   :  { %v222_v54 = vmax.f32 %v216_v50, 0.0 }
 0x121   :  { %v221_v55 = vmax.f32 %v211_v52, 0.0  ;;  %593 = vmatprep.subr.bf16.mxu1 %v592_v53 }
 0x122   :  { %595 = vmatpush3.bf16.msra.mxu1 %v592_v53 }
 0x123   :  { %v596_v56 = vpack.c.bf16 %v222_v54, %v221_v55 }
 0x125   :  { %598 = vmatprep.subr.msk.bf16.mxu1 %vm597_vm5, %v596_v56 }
 0x126   :  { %601 = vmatpush3.bf16.msk.msra.mxu1 %vm597_vm5, %v596_v56 }
 0x127   :  { %602 = vmatprep.subr.bf16.mxu1 %v644_v58 }
 0x129   :  { %535 = vmatmul.mubr.msk.f32.vlgmr.msra.gmra.mrb[0].mxu1 %vm237_vm2, %v224_v57 }
 0x12a   :  { %541 = vmatprep.mubr.msk.f32.mxu1 %vm645_vm6, %v646_v59 }
 0x1fc   :  { %v536_v61 = vpop.f32.mrb[0].mxu1 }
 0x1fd   :  { %v320_v63 = vadd.f32 %v536_v61, %v235_v60  ;;  %v314_v0 = vpop.f32.mrb[1].mxu1 }
 0x1fe   :  { %v315_v1 = vadd.f32 %v314_v0, %v230_v62 }
 0x1ff   :  { %v324_v2 = vmax.f32 %v320_v63, 0.0 }
 0x200   :  { %v323_v3 = vmax.f32 %v315_v1, 0.0 }
 0x202   :  { %v603_v4 = vpack.c.bf16 %v324_v2, %v323_v3 }
 0x204   :  { %605 = vmatpush3.bf16.msk.msra.mxu1 %vm604_vm8, %v603_v4 }
 0x207   :  { %542 = vmatmul.mubr.msk.f32.vlgmr.msra.gmra.mrb[2].mxu1 %vm73_vm0, %v325_v5 }
 0x2da   :  { %v409_v11 = vpop.f32.mrb[2].mxu1 }
 0x2db   :  { %v410_v12 = vadd.f32 %v409_v11, %v335_v10  ;;  %v543_v13 = vpop.f32.mrb[3].mxu1 }
 0x2dd   :  { %v413_v14 = vsub.f32 0.0, %v410_v12 }
 0x2df   :  { %v414_v15 = vmul.f32 1.442695, %v413_v14 }
 0x2e1   :  { %614 = vpow2.f32 %v414_v15 }
 0x2eb   :  { %v615_v16 = vpop.eup %614 }
 0x2ec   :  { %v416_v17 = vadd.f32 1.0, %v615_v16 }
 0x2ee   :  { %616 = vrcp.f32 %v416_v17 }
 0x2f8   :  { %v617_v18 = vpop.eup %616 }
 0x2f9   :  { %419 = vst [vmem:[#allocation3] sm:$0x1] %v617_v18 }
 0x2fa   :  { %629 = shalt.err (!%p626_p4)
}
 0x2fb   :  { %s630_s4 = scalar_lea.hbm %s844_s7, 16 }
 0x2fc   :  { %p631_p5 = scmp.ne.s32.totalorder %s844_s7, %s630_s4  ;;  %p634_p6 = scmp.lt.u32.totalorder %s630_s4, %s844_s7 }
 0x2fe   :  { %p636_p7 = pnand %p634_p6, %p631_p5 }
 0x300   :  { %639 = shalt.err (!%p636_p7)
}
 0x301   :  { %429 = dma.vmem_to_hbm [thread:$0]  %s427_s8, 16, %s844_s7, [#allocation4]  }
 0x302   :  { %640 = dma.done.wait [#allocation4], 16  }
 0x303   :  { %641 = vsyncadd [#allocation4], 4294967280 }
 0x304   :  { %433 = vsyncpa [#allocation4], 1 }

</bundles_post_ra>
